<compile_context>
chip_gen: v6e
topology: v6e:2x2x1
jax: 0.10.0
libtpu: 0.0.40
codegen_flags: <defaults>
</compile_context>

<pallas_src>
import functools

import jax
import jax.numpy as jnp
from jax.experimental import pallas as pl
from jax.experimental.pallas import tpu as pltpu

_LANE = 128
_TM_ALIGN = 256                      # row-block alignment (safe for f32/bf16/int8 packing)
_MAX_TM = 1024                       # rows per block; bigger buys nothing at HBM roofline
_TILE_BYTES_CAP = 4 * 1024 * 1024    # per input buffer; ~2-4 MiB saturates HBM BW
_MIB = 1024 * 1024


def _round_up(a, b):
    return ((a + b - 1) // b) * b


def _round_down(a, b):
    return (a // b) * b


def _vmem_limit_bytes(n_in_bufs, tm, cols, itemsize, n_scratch):
    """Right-sized scoped-VMEM limit: actual buffers + headroom, not 0.7*capacity."""
    in_bytes = n_in_bufs * tm * _round_up(cols, _LANE) * itemsize
    out_bytes = 2 * tm * _LANE * max(itemsize, 4)      # (tm, 1) block is lane-padded
    scratch_bytes = n_scratch * tm * _LANE * 4
    need = in_bytes + out_bytes + scratch_bytes + 6 * _MIB   # Mosaic internal headroom
    return int(min(48 * _MIB, max(16 * _MIB, _round_up(need, _MIB))))


def _avgmax_kernel_single(x_ref, o_ref, *, scale):
    """One block spans the full HW axis. x_ref: (TM, HW), o_ref: (TM, 1)."""
    x = x_ref[...]
    s = jnp.sum(x, axis=-1, keepdims=True, dtype=jnp.float32)    # f32 accumulate
    m = jnp.max(x, axis=-1, keepdims=True).astype(jnp.float32)   # max in input dtype
    o_ref[...] = (s * scale + 0.5 * m).astype(o_ref.dtype)


def _avgmax_kernel_chunked(x_ref, o_ref, sum_ref, max_ref, *,
                           scale, hw, tk, mask_last, neg_fill):
    """HW chunked along grid axis 1; running sum/max accumulate in VMEM scratch."""
    k = pl.program_id(1)
    last = pl.num_programs(1) - 1

    @pl.when(k == 0)
    def _init():
        sum_ref[...] = jnp.zeros_like(sum_ref)
        max_ref[...] = jnp.full_like(max_ref, -jnp.inf)

    def _accumulate(x_sum, x_max):
        sum_ref[...] = sum_ref[...] + jnp.sum(
            x_sum, axis=-1, keepdims=True, dtype=jnp.float32)
        max_ref[...] = jnp.maximum(
            max_ref[...], jnp.max(x_max, axis=-1, keepdims=True).astype(jnp.float32))

    if mask_last:
        # Static: HW % tk != 0.  Only the final chunk pays for the mask; all
        # earlier chunks take the unmasked fast path (runtime-gated via pl.when).
        @pl.when(k < last)
        def _full_chunk():
            x = x_ref[...]
            _accumulate(x, x)

        @pl.when(k == last)
        def _ragged_chunk():
            x = x_ref[...]
            lane = jax.lax.broadcasted_iota(jnp.int32, x.shape, 1)
            valid = (k * tk + lane) < hw
            _accumulate(jnp.where(valid, x, jnp.zeros((), x.dtype)),
                        jnp.where(valid, x, jnp.full((), neg_fill, x.dtype)))
    else:
        x = x_ref[...]
        _accumulate(x, x)

    @pl.when(k == last)
    def _finalize():
        o_ref[...] = (sum_ref[...] * scale + 0.5 * max_ref[...]).astype(o_ref.dtype)


def adaptive_avgmax_pool2d(x, output_size=1, *, _tile_budget_bytes=None):
    """x: (N, C, H, W). Only output_size=1 (global pooling) is supported."""
    if output_size != 1:
        # TODO(synk): general adaptive pooling (output_size > 1) needs per-bin
        # windowed reductions; only the global (1x1) case is implemented here.
        raise NotImplementedError("only output_size=1 supported")

    N, C, H, W = x.shape
    NC, HW = N * C, H * W
    # NOTE: copy-free only for the standard row-major NCHW layout.
    rows = x.reshape(NC, HW)
    itemsize = jnp.dtype(x.dtype).itemsize
    scale = 0.5 / HW                        # 0.5 * mean == sum * (0.5 / HW)

    tile_cap = (_TILE_BYTES_CAP if _tile_budget_bytes is None
                else int(_tile_budget_bytes))
    padded_hw = _round_up(HW, _LANE)        # VMEM lane padding of one row
    row_bytes = padded_hw * itemsize
    tm_cap = tile_cap // row_bytes          # rows per input buffer at the cap

    out_shape = jax.ShapeDtypeStruct((NC, 1), x.dtype)

    if tm_cap >= min(NC, _TM_ALIGN):
        # ---- single-pass path: one block spans the full HW axis ----
        if NC < 2 * _TM_ALIGN and NC <= tm_cap:
            tm = NC                                      # too small to split usefully
        else:
            # Split into >=2 (target ~8) 256-aligned row blocks so both v7x
            # TensorCores get work and the DMA pipeline overlaps, while keeping
            # each input buffer <= ~4 MiB and TM within [256, 1024] rows.
            tm_upper = min(_MAX_TM, _round_down(tm_cap, _TM_ALIGN))
            tm_floor = 2 * _TM_ALIGN if NC >= 4 * _TM_ALIGN else _TM_ALIGN
            tm_target = _round_up(pl.cdiv(NC, 8), _TM_ALIGN)
            tm = max(_TM_ALIGN, min(tm_upper, max(tm_floor, tm_target)))
        grid_rows = pl.cdiv(NC, tm)
        n_in_bufs = 3 if grid_rows >= 4 else 2
        in_spec_kwargs = {"pipeline_mode": pl.Buffered(3)} if n_in_bufs == 3 else {}
        out = pl.pallas_call(
            functools.partial(_avgmax_kernel_single, scale=scale),
            out_shape=out_shape,
            grid_spec=pltpu.PrefetchScalarGridSpec(
                num_scalar_prefetch=0,
                grid=(grid_rows,),
                in_specs=[pl.BlockSpec((tm, HW), lambda i: (i, 0),
                                       **in_spec_kwargs)],
                out_specs=pl.BlockSpec((tm, 1), lambda i: (i, 0)),
            ),
            compiler_params=pltpu.CompilerParams(
                dimension_semantics=("parallel",),
                vmem_limit_bytes=_vmem_limit_bytes(
                    n_in_bufs, tm, HW, itemsize, n_scratch=0)),
        )(rows)
    else:
        # ---- chunked-HW path: a (TM, full-HW) tile exceeds the tile cap ----
        tm = NC if NC <= _MAX_TM else _MAX_TM
        tk = _round_down(tile_cap // max(tm * itemsize, 1), _LANE)
        tk_cap = HW if HW < _LANE else _round_down(HW, _LANE)
        tk = max(min(tk, tk_cap), min(_LANE, tk_cap))
        grid_rows = pl.cdiv(NC, tm)
        grid_k = pl.cdiv(HW, tk)
        mask_last = (HW % tk) != 0
        if jnp.issubdtype(x.dtype, jnp.floating):
            neg_fill = float("-inf")
        else:
            neg_fill = int(jnp.iinfo(x.dtype).min)
        n_in_bufs = 3 if grid_rows * grid_k >= 4 else 2
        in_spec_kwargs = {"pipeline_mode": pl.Buffered(3)} if n_in_bufs == 3 else {}
        out = pl.pallas_call(
            functools.partial(_avgmax_kernel_chunked, scale=scale, hw=HW, tk=tk,
                              mask_last=mask_last, neg_fill=neg_fill),
            out_shape=out_shape,
            grid_spec=pltpu.PrefetchScalarGridSpec(
                num_scalar_prefetch=0,
                grid=(grid_rows, grid_k),
                in_specs=[pl.BlockSpec((tm, tk), lambda i, k: (i, k),
                                       **in_spec_kwargs)],
                out_specs=pl.BlockSpec((tm, 1), lambda i, k: (i, 0)),
                scratch_shapes=[pltpu.VMEM((tm, 1), jnp.float32),
                                pltpu.VMEM((tm, 1), jnp.float32)],
            ),
            compiler_params=pltpu.CompilerParams(
                dimension_semantics=("parallel", "arbitrary"),
                vmem_limit_bytes=_vmem_limit_bytes(
                    n_in_bufs, tm, tk, itemsize, n_scratch=2)),
        )(rows)

    return out.reshape(N, C, 1, 1)


class AdaptiveAvgMaxPool2d:
    """JAX/Pallas equivalent of the PyTorch module (no parameters)."""

    def __init__(self, output_size=1):
        self.output_size = output_size

    def __call__(self, x):
        return adaptive_avgmax_pool2d(x, self.output_size)


def _reference(x):
    return 0.5 * (jnp.mean(x, axis=(2, 3), keepdims=True)
                  + jnp.max(x, axis=(2, 3), keepdims=True))


if __name__ == "__main__":
    mod = AdaptiveAvgMaxPool2d(output_size=1)
    k1, k2, k3, k4 = jax.random.split(jax.random.PRNGKey(0), 4)

    # 1) Small case (single full-block path, grid=(1,)).
    x1 = jax.random.normal(k1, (2, 4, 16, 16), dtype=jnp.float32)
    y1 = jax.block_until_ready(mod(x1))
    assert y1.shape == (2, 4, 1, 1)
    assert jnp.allclose(y1, _reference(x1), atol=1e-5, rtol=1e-5)

    # 2) NC=1300: multi-block row tiling with a ragged (partial) last row block.
    x2 = jax.random.normal(k2, (4, 325, 7, 7), dtype=jnp.float32)
    y2 = jax.block_until_ready(mod(x2))
    assert jnp.allclose(y2, _reference(x2), atol=1e-5, rtol=1e-5)

    # 3) Chunked-HW accumulator path with a masked ragged last chunk
    #    (forced via a tiny tile budget so the test stays small).
    x3 = jax.random.normal(k3, (2, 4, 25, 40), dtype=jnp.float32)
    y3 = jax.block_until_ready(
        adaptive_avgmax_pool2d(x3, _tile_budget_bytes=16 * 1024))
    assert jnp.allclose(y3, _reference(x3), atol=1e-5, rtol=1e-5)

    # 4) NC=2048: >=4 row blocks -> triple-buffered (pl.Buffered(3)) input path.
    x4 = jax.random.normal(k4, (8, 256, 7, 7), dtype=jnp.float32)
    y4 = jax.block_until_ready(mod(x4))
    assert jnp.allclose(y4, _reference(x4), atol=1e-5, rtol=1e-5)

    print("KERNEL_OK")
</pallas_src>

<mosaic_0001>
module attributes {stable_mosaic.version = 11 : i64} {
  func.func @_avgmax_kernel_single(%arg0: i32, %arg1: memref<8x256xf32, #tpu.memory_space<vmem>>, %arg2: memref<8x1xf32, #tpu.memory_space<vmem>>) attributes {dimension_semantics = [#tpu.dimension_semantics<parallel>], iteration_bounds = array<i64: 1>, scalar_prefetch = 0 : i64, scratch_operands = 0 : i64, tpu.core_type = #tpu.core_type<tc>, window_params = [{transform_indices = @transform_0, window_bounds = array<i64: 8, 256>}, {transform_indices = @transform_1, window_bounds = array<i64: 8, 1>}]} {
    %c0 = arith.constant 0 : index
    %c0_0 = arith.constant 0 : index
    %0 = vector.load %arg1[%c0, %c0_0] : memref<8x256xf32, #tpu.memory_space<vmem>>, vector<8x256xf32>
    %cst = arith.constant dense<0.000000e+00> : vector<8xf32>
    %1 = vector.multi_reduction <add>, %0, %cst [1] : vector<8x256xf32> to vector<8xf32>
    %2 = vector.shape_cast %1 : vector<8xf32> to vector<8x1xf32>
    %cst_1 = arith.constant dense<0xFF800000> : vector<8xf32>
    %3 = vector.multi_reduction <maximumf>, %0, %cst_1 [1] : vector<8x256xf32> to vector<8xf32>
    %4 = vector.shape_cast %3 : vector<8xf32> to vector<8x1xf32>
    %cst_2 = arith.constant 0.001953125 : f32
    %5 = vector.broadcast %cst_2 : f32 to vector<8x1xf32>
    %6 = arith.mulf %2, %5 : vector<8x1xf32>
    %cst_3 = arith.constant 5.000000e-01 : f32
    %7 = vector.broadcast %cst_3 : f32 to vector<8x1xf32>
    %8 = arith.mulf %7, %4 : vector<8x1xf32>
    %9 = arith.addf %6, %8 : vector<8x1xf32>
    %c0_4 = arith.constant 0 : index
    %c0_5 = arith.constant 0 : index
    %10 = vector.load %arg2[%c0_4, %c0_5] : memref<8x1xf32, #tpu.memory_space<vmem>>, vector<8x1xf32>
    tpu.vector_store %arg2[%c0_4, %c0_5], %9 {strides = array<i32>} : memref<8x1xf32, #tpu.memory_space<vmem>>, vector<8x1xf32>,
    return
  }
  func.func @transform_0(%arg0: i32) -> (i32, i32) {
    %c0_i32 = arith.constant 0 : i32
    %c0_i32_0 = arith.constant 0 : i32
    return %arg0, %c0_i32 : i32, i32
  }
  func.func @transform_1(%arg0: i32) -> (i32, i32) {
    %c0_i32 = arith.constant 0 : i32
    %c0_i32_0 = arith.constant 0 : i32
    return %arg0, %c0_i32 : i32, i32
  }
}

</mosaic_0001>

<bundles_post_ra>
// kernel: tpu_custom_call.1
= control target key start
LH: loop header
LB: loop body
LE: loop exit
PB: predicated region body
PF: predicated region fallthrough
CT: control target
= control target key end

     0   :  { %6 = vsyncpa [#allocation3], 0  ;;  %s61_s6 = smov [#allocation2]   ;;  %s78_s0 = inlined_call_operand.hbm [shape: f32[8,256], index: 0, kind: input, shape index: {}]   ;;  %s79_s1 = inlined_call_operand.vmem [shape: f32[8,1], index: 1, kind: output, shape index: {}]  }
   0x1   :  { %s13_s7 = sshll.u32 %s61_s6, 4  ;;  %s14_s7 = int_to_ptr.vmem [resolvable:$true] %s13_s7 }
   0x2   :  { %s47_s8 = scalar_lea.vmem %s14_s7, 256  ;;  %p52_p1 = scmp.lt.s32.totalorder %s14_s7, %s14_s7 }
   0x3   :  { %p48_p0 = scmp.ne.s32.totalorder %s14_s7, %s47_s8  ;;  %p53_p2 = scmp.lt.s32.totalorder %s47_s8, %s47_s8 }
   0x5   :  { %p54_p3 = por %p53_p2, %p52_p1 }
   0x7   :  { %p55_p4 = pnand %p54_p3, %p48_p0 }
   0x9   :  { %58 = shalt.err (!%p55_p4)
}
   0xa   :  { %16 = dma.hbm_to_vmem [thread:$0]  %s78_s0, 256, %s14_s7, [#allocation3]  }
   0xb   :  { %59 = dma.done.wait [#allocation3], 256  }
   0xc   :  { %60 = vsyncadd [#allocation3], 4294967040  ;;  %v20_v0 = vld [vmem:[#allocation2] sm:$0xff]  ;;  %v21_v1 = vld [vmem:[#allocation2 + $0x8] sm:$0xff]  ;;  %vm31_vm0 = vcmask 7168  }
   0xd   :  { %v22_v2 = vadd.f32 %v21_v1, %v20_v0  ;;  %v25_v3 = vmax.f32 %v20_v0, %v21_v1 }
   0xf   :  { %23 = vadd.xlane.f32.xlu0 %v22_v2 }
  0x13   :  { %26 = vmax.xlane.f32.xlu0 %v25_v3 }
  0x98   :  { %v24_v4 = vpop.xlane.xlu0 %23 }
  0x99   :  { %v28_v6 = vmul.f32 0.001953125, %v24_v4 }
  0x9c   :  { %v27_v5 = vpop.xlane.xlu0 %26 }
  0x9d   :  { %v29_v7 = vmul.f32 0.5, %v27_v5 }
  0x9f   :  { %v30_v8 = vadd.f32 %v29_v7, %v28_v6 }
  0xa1   :  { %32 = vst.msk [vmem:[%s79_s1] sm:$0xff] %vm31_vm0, %v30_v8 }
  0xa2   :  { %37 = vsyncpa [#allocation3], 1 }

</bundles_post_ra>
